<compile_context>
chip_gen: v7x
topology: tpu7x:2x2x1
jax: 0.10.0
libtpu: 0.0.40
codegen_flags: <defaults>
</compile_context>

<pallas_src>
import functools

import jax
import jax.numpy as jnp
import numpy as np
from jax.experimental import pallas as pl
from jax.experimental.pallas import tpu as pltpu

SMOOTH = 1e-6
LANE = 128


def _product_loss_kernel(pred_ref, gt_ref, part_ref, *,
                         rows_total, rows_block, need_mask):
    # pred_ref: (B, rows_block, 128)      gt_ref: (B, 1, rows_block, 128)
    p = jnp.tanh(pred_ref[...].astype(jnp.float32))
    g = gt_ref[...][:, 0, :, :].astype(jnp.float32)   # squeeze channel dim

    if need_mask:
        # Ragged tail of the row grid: rows >= rows_total are garbage (OOB
        # block read); zero them *before* any product so they contribute
        # nothing to any sum and NaNs cannot propagate.
        k = pl.program_id(0)
        row_ids = jax.lax.broadcasted_iota(jnp.int32, (rows_block, LANE), 0)
        valid = (row_ids + k * rows_block) < rows_total
        p = jnp.where(valid, p, 0.0)
        g = jnp.where(valid, g, 0.0)

    def rsum(x):  # (B, rows_block, 128) -> (B, 1)
        # Sublane (row) axis first: rows_block/8 VPU vreg-adds + one 8-way
        # sublane reduce per batch, then a single cross-lane reduce of the
        # (B, 128) remainder. Far less XLU pressure than lane-first.
        return jnp.sum(jnp.sum(x, axis=1), axis=-1, keepdims=True)

    pt2 = rsum(p * p)
    yt2 = rsum(g * g)
    ytpt = rsum(g * p)
    sad = rsum(jnp.abs(p - g))

    part = jnp.concatenate([pt2, yt2, ytpt, sad], axis=-1)   # (B, 4)
    part_ref[...] = part.reshape(1, part.shape[0], 4)


def product_loss(pred, gt, *, block_rows=None,
                 input_vmem_budget=16 * 1024 * 1024):
    """pred: (B, 1, H, W), gt: (B, 2, H, W). Returns scalar f32 loss."""
    assert pred.ndim == 4 and gt.ndim == 4
    B, Cp, H, W = pred.shape
    assert Cp == 1, "pred must have exactly 1 channel"
    assert gt.shape[0] == B and gt.shape[2:] == (H, W)
    # PyTorch asserts gt[:, 1:].shape[1] == 1, i.e. gt has exactly 2 channels.
    assert gt.shape[1] == 2, "gt must have exactly 2 channels"
    C = gt.shape[1]

    n = H * W
    R = pl.cdiv(n, LANE)
    n_lanes = R * LANE

    p2 = pred.reshape(B, n)
    g3 = gt.reshape(B, C, n)
    if n_lanes != n:
        # Rare path: lane-pad with zeros (tanh(0)=0, gt pad=0 -> contributes 0).
        p2 = jnp.pad(p2, ((0, 0), (0, n_lanes - n)))
        g3 = jnp.pad(g3, ((0, 0), (0, 0), (0, n_lanes - n)))
    p3 = p2.reshape(B, R, LANE)          # (B, R, 128)
    g4 = g3.reshape(B, C, R, LANE)       # (B, 2, R, 128)

    if block_rows is None:
        itemsize = max(pred.dtype.itemsize, gt.dtype.itemsize)
        # Target ~1 MiB per input block (measured sweet spot for mem-bound
        # kernels): big enough that per-step overhead vanishes, small enough
        # that DMA/compute pipelining overlaps and large images span >=2
        # blocks (so the "parallel" axis shards across v7x's two cores).
        target_rows = (1 << 20) // (B * LANE * itemsize)
        # Hard cap: 2 inputs x 2 pipeline buffers x block bytes <= budget.
        cap_rows = input_vmem_budget // (4 * B * LANE * itemsize)
        block_rows = max(8, min(target_rows, cap_rows))
    block_rows = min(block_rows, R)
    if block_rows < R:
        block_rows = max(8, (block_rows // 8) * 8)
    n_blocks = pl.cdiv(R, block_rows)
    need_mask = (R % block_rows) != 0

    kernel = functools.partial(
        _product_loss_kernel,
        rows_total=R, rows_block=block_rows, need_mask=need_mask)

    parts = pl.pallas_call(
        kernel,
        out_shape=jax.ShapeDtypeStruct((n_blocks, B, 4), jnp.float32),
        grid_spec=pltpu.PrefetchScalarGridSpec(
            num_scalar_prefetch=0,
            grid=(n_blocks,),
            in_specs=[
                pl.BlockSpec((B, block_rows, LANE), lambda k: (0, k, 0)),
                # channel 1 of gt selected directly by the index_map
                pl.BlockSpec((B, 1, block_rows, LANE), lambda k: (0, 1, k, 0)),
            ],
            out_specs=pl.BlockSpec((1, B, 4), lambda k: (k, 0, 0)),
        ),
        compiler_params=pltpu.CompilerParams(
            dimension_semantics=("parallel",),
            vmem_limit_bytes=32 * 1024 * 1024,
        ),
    )(p3, g4)

    # Tiny scalar epilogue in plain JAX.
    sums = jnp.sum(parts, axis=0)                     # (B, 4)
    pt2, yt2, ytpt, sad = (sums[:, i] for i in range(4))
    frac = (ytpt + SMOOTH) / (ytpt + pt2 + yt2 + SMOOTH)
    return -jnp.mean(frac) + jnp.sum(sad) / jnp.float32(B * n)


def product_loss_ref(pred, gt):
    """Pure JAX reference mirroring the PyTorch module."""
    B = pred.shape[0]
    g = gt[:, 1:, :, :].reshape(B, -1).astype(jnp.float32)
    p = jnp.tanh(pred.astype(jnp.float32)).reshape(B, -1)
    pt2 = jnp.sum(p * p, axis=-1)
    yt2 = jnp.sum(g * g, axis=-1)
    ytpt = jnp.sum(g * p, axis=-1)
    loss = (ytpt + SMOOTH) / (ytpt + pt2 + yt2 + SMOOTH)
    loss = -jnp.mean(loss)
    return loss + jnp.mean(jnp.abs(p - g))


if __name__ == "__main__":
    key = jax.random.PRNGKey(0)
    k1, k2, k3, k4 = jax.random.split(key, 4)

    # Case 1: small shapes, whole image fits in a single block (grid=(1,)).
    B, H, W = 2, 16, 16
    pred = jax.random.normal(k1, (B, 1, H, W), dtype=jnp.float32)
    gt = (jax.random.uniform(k2, (B, 2, H, W)) > 0.5).astype(jnp.float32)
    out = jax.block_until_ready(product_loss(pred, gt))
    ref = jax.block_until_ready(product_loss_ref(pred, gt))
    assert np.allclose(np.asarray(out), np.asarray(ref),
                       rtol=1e-5, atol=1e-5), (out, ref)

    # Case 2: multi-block grid with a ragged row tail (exercises in-kernel
    # masking and the parallel partial-sum outputs). N = 1280 -> R = 10 rows,
    # block_rows = 8 -> 2 blocks, second block partially out of bounds.
    B2, H2, W2 = 2, 32, 40
    pred2 = jax.random.normal(k3, (B2, 1, H2, W2), dtype=jnp.float32)
    gt2 = (jax.random.uniform(k4, (B2, 2, H2, W2)) > 0.5).astype(jnp.float32)
    out2 = jax.block_until_ready(product_loss(pred2, gt2, block_rows=8))
    ref2 = jax.block_until_ready(product_loss_ref(pred2, gt2))
    assert np.allclose(np.asarray(out2), np.asarray(ref2),
                       rtol=1e-5, atol=1e-5), (out2, ref2)

    print("KERNEL_OK")
</pallas_src>

<mosaic_0001>
module attributes {stable_mosaic.version = 11 : i64} {
  func.func @_product_loss_kernel(%arg0: i32, %arg1: memref<2x2x128xf32, #tpu.memory_space<vmem>>, %arg2: memref<2x1x2x128xf32, #tpu.memory_space<vmem>>, %arg3: memref<1x2x4xf32, #tpu.memory_space<vmem>>) attributes {dimension_semantics = [#tpu.dimension_semantics<parallel>], iteration_bounds = array<i64: 1>, scalar_prefetch = 0 : i64, scratch_operands = 0 : i64, tpu.core_type = #tpu.core_type<tc>, window_params = [{transform_indices = @transform_0, window_bounds = array<i64: 2, 2, 128>}, {transform_indices = @transform_1, window_bounds = array<i64: 2, 1, 2, 128>}, {transform_indices = @transform_2, window_bounds = array<i64: 1, 2, 4>}]} {
    %c0 = arith.constant 0 : index
    %c0_0 = arith.constant 0 : index
    %c0_1 = arith.constant 0 : index
    %0 = vector.load %arg1[%c0, %c0_0, %c0_1] : memref<2x2x128xf32, #tpu.memory_space<vmem>>, vector<2x2x128xf32>
    %1 = math.tanh %0 : vector<2x2x128xf32>
    %c0_2 = arith.constant 0 : index
    %c0_3 = arith.constant 0 : index
    %c0_4 = arith.constant 0 : index
    %c0_5 = arith.constant 0 : index
    %2 = vector.load %arg2[%c0_2, %c0_3, %c0_4, %c0_5] : memref<2x1x2x128xf32, #tpu.memory_space<vmem>>, vector<2x1x2x128xf32>
    %3 = vector.shape_cast %2 : vector<2x1x2x128xf32> to vector<2x2x128xf32>
    %4 = arith.mulf %1, %1 : vector<2x2x128xf32>
    %cst = arith.constant dense<0.000000e+00> : vector<2x128xf32>
    %5 = vector.multi_reduction <add>, %4, %cst [1] : vector<2x2x128xf32> to vector<2x128xf32>
    %cst_6 = arith.constant dense<0.000000e+00> : vector<2xf32>
    %6 = vector.multi_reduction <add>, %5, %cst_6 [1] : vector<2x128xf32> to vector<2xf32>
    %7 = vector.shape_cast %6 : vector<2xf32> to vector<2x1xf32>
    %8 = arith.mulf %3, %3 : vector<2x2x128xf32>
    %cst_7 = arith.constant dense<0.000000e+00> : vector<2x128xf32>
    %9 = vector.multi_reduction <add>, %8, %cst_7 [1] : vector<2x2x128xf32> to vector<2x128xf32>
    %cst_8 = arith.constant dense<0.000000e+00> : vector<2xf32>
    %10 = vector.multi_reduction <add>, %9, %cst_8 [1] : vector<2x128xf32> to vector<2xf32>
    %11 = vector.shape_cast %10 : vector<2xf32> to vector<2x1xf32>
    %12 = arith.mulf %3, %1 : vector<2x2x128xf32>
    %cst_9 = arith.constant dense<0.000000e+00> : vector<2x128xf32>
    %13 = vector.multi_reduction <add>, %12, %cst_9 [1] : vector<2x2x128xf32> to vector<2x128xf32>
    %cst_10 = arith.constant dense<0.000000e+00> : vector<2xf32>
    %14 = vector.multi_reduction <add>, %13, %cst_10 [1] : vector<2x128xf32> to vector<2xf32>
    %15 = vector.shape_cast %14 : vector<2xf32> to vector<2x1xf32>
    %16 = arith.subf %1, %3 : vector<2x2x128xf32>
    %17 = math.absf %16 : vector<2x2x128xf32>
    %cst_11 = arith.constant dense<0.000000e+00> : vector<2x128xf32>
    %18 = vector.multi_reduction <add>, %17, %cst_11 [1] : vector<2x2x128xf32> to vector<2x128xf32>
    %cst_12 = arith.constant dense<0.000000e+00> : vector<2xf32>
    %19 = vector.multi_reduction <add>, %18, %cst_12 [1] : vector<2x128xf32> to vector<2xf32>
    %20 = vector.shape_cast %19 : vector<2xf32> to vector<2x1xf32>
    %21 = tpu.concatenate %7, %11, %15, %20 in 1 : vector<2x1xf32>, vector<2x1xf32>, vector<2x1xf32>, vector<2x1xf32> -> vector<2x4xf32>
    %22 = vector.shape_cast %21 : vector<2x4xf32> to vector<1x2x4xf32>
    %c0_13 = arith.constant 0 : index
    %c0_14 = arith.constant 0 : index
    %c0_15 = arith.constant 0 : index
    %23 = vector.load %arg3[%c0_13, %c0_14, %c0_15] : memref<1x2x4xf32, #tpu.memory_space<vmem>>, vector<1x2x4xf32>
    tpu.vector_store %arg3[%c0_13, %c0_14, %c0_15], %22 {strides = array<i32>} : memref<1x2x4xf32, #tpu.memory_space<vmem>>, vector<1x2x4xf32>,
    return
  }
  func.func @transform_0(%arg0: i32) -> (i32, i32, i32) {
    %c0_i32 = arith.constant 0 : i32
    %c0_i32_0 = arith.constant 0 : i32
    %c0_i32_1 = arith.constant 0 : i32
    return %c0_i32, %arg0, %c0_i32_0 : i32, i32, i32
  }
  func.func @transform_1(%arg0: i32) -> (i32, i32, i32, i32) {
    %c0_i32 = arith.constant 0 : i32
    %c1_i32 = arith.constant 1 : i32
    %c0_i32_0 = arith.constant 0 : i32
    %c0_i32_1 = arith.constant 0 : i32
    return %c0_i32, %c1_i32, %arg0, %c0_i32_0 : i32, i32, i32, i32
  }
  func.func @transform_2(%arg0: i32) -> (i32, i32, i32) {
    %c0_i32 = arith.constant 0 : i32
    %c0_i32_0 = arith.constant 0 : i32
    %c0_i32_1 = arith.constant 0 : i32
    return %arg0, %c0_i32, %c0_i32_0 : i32, i32, i32
  }
}

</mosaic_0001>

<bundles_post_ra>
// kernel: tpu_custom_call.1
= control target key start
LH: loop header
LB: loop body
LE: loop exit
PB: predicated region body
PF: predicated region fallthrough
CT: control target
= control target key end

     0   :  { %7 = vsyncpa [#allocation3], 0  ;;  %s331_s0 = inlined_call_operand.hbm [shape: f32[2,2,128], index: 0, kind: input, shape index: {}]   ;;  %s332_s1 = inlined_call_operand.hbm [shape: f32[2,2,2,128], index: 1, kind: input, shape index: {}]   ;;  %s333_s2 = inlined_call_operand.hbm [shape: f32[1,2,4], index: 2, kind: output, shape index: {}]  }
   0x1   :  { %8 = vsyncpa [#allocation6], 0 }
   0x2   :  { %9 = vsyncpa [#allocation4], 0  ;;  %s252_s9 = smov [#allocation2]   ;;  %s276_s13 = scalar_lea.hbm %s332_s1, 32 }
   0x3   :  { %s15_s10 = sshll.u32 %s252_s9, 4  ;;  %s177_s16 = scalar_lea.hbm %s331_s0, 64  ;;  %s16_s10 = int_to_ptr.vmem [resolvable:$true] %s15_s10 }
   0x4   :  { %p178_p0 = scmp.ne.s32.totalorder %s331_s0, %s177_s16  ;;  %p181_p1 = scmp.lt.u32.totalorder %s177_s16, %s331_s0 }
   0x6   :  { %p183_p2 = pnand %p181_p1, %p178_p0 }
   0x8   :  { %186 = shalt.err (!%p183_p2)
}
   0x9   :  { %s187_s21 = scalar_lea.vmem %s16_s10, 64  ;;  %p192_p4 = scmp.lt.s32.totalorder %s16_s10, %s16_s10 }
   0xa   :  { %p188_p3 = scmp.ne.s32.totalorder %s16_s10, %s187_s21  ;;  %p193_p5 = scmp.lt.s32.totalorder %s187_s21, %s187_s21 }
   0xc   :  { %p194_p6 = por %p193_p5, %p192_p4 }
   0xe   :  { %p195_p7 = pnand %p194_p6, %p188_p3 }
  0x10   :  { %198 = shalt.err (!%p195_p7)
}
  0x11   :  { %s253_s22 = smov 32   ;;  %s254_s23 = smov 2  }
  0x12   :  { %21 = dma.hbm_to_vmem [thread:$0]  %s331_s0, 64, %s16_s10, [#allocation3], %s253_s22, %s253_s22, %s254_s23  }
  0x13   :  { %s255_s26 = smov [#allocation5]   ;;  %s223_s30 = scalar_lea.hbm %s332_s1, 96 }
  0x14   :  { %s28_s27 = sshll.u32 %s255_s26, 4  ;;  %p200_p8 = scmp.ne.s32.totalorder %s276_s13, %s223_s30  ;;  %s29_s27 = int_to_ptr.vmem [resolvable:$true] %s28_s27 }
  0x15   :  { %s201_s5 = scalar_lea.hbm %s332_s1, 128  ;;  %p202_p9 = scmp.lt.u32.totalorder %s276_s13, %s332_s1 }
  0x16   :  { %p203_p10 = scmp.lt.u32.totalorder %s201_s5, %s223_s30  ;;  %p205_p12 = scmp.lt.u32.totalorder %s223_s30, %s276_s13 }
  0x18   :  { %p204_p11 = por %p203_p10, %p202_p9 }
  0x1a   :  { %p206_p13 = por %p205_p12, %p204_p11 }
  0x1c   :  { %p207_p0 = pnand %p206_p13, %p200_p8 }
  0x1e   :  { %210 = shalt.err (!%p207_p0)
}
  0x1f   :  { %s211_s0 = scalar_lea.vmem %s29_s27, 64  ;;  %p216_p2 = scmp.lt.s32.totalorder %s29_s27, %s29_s27 }
  0x20   :  { %p212_p1 = scmp.ne.s32.totalorder %s29_s27, %s211_s0  ;;  %p217_p3 = scmp.lt.s32.totalorder %s211_s0, %s211_s0 }
  0x22   :  { %p218_p4 = por %p217_p3, %p216_p2 }
  0x24   :  { %p219_p5 = pnand %p218_p4, %p212_p1 }
  0x26   :  { %222 = shalt.err (!%p219_p5)
}
  0x27   :  { %s256_s8 = smov 64  }
  0x28   :  { %34 = dma.hbm_to_vmem [thread:$0]  %s276_s13, 64, %s29_s27, [#allocation6], %s256_s8, %s253_s22, %s254_s23  }
  0x29   :  { %246 = dma.done.wait [#allocation3], 64  }
  0x2a   :  { %247 = vsyncadd [#allocation3], 4294967232 }
  0x2b   :  { %248 = dma.done.wait [#allocation6], 64  }
  0x2c   :  { %249 = vsyncadd [#allocation6], 4294967232  ;;  %v41_v0 = vld [vmem:[#allocation2] sm:$0x3]  ;;  %v42_v1 = vld [vmem:[#allocation2 + $0x2] sm:$0x3] }
  0x2d   :  { %v45_v2 = vld [vmem:[#allocation5] sm:$0x3]  ;;  %173 = vtanh.f32 %v41_v0  ;;  %v46_v3 = vld [vmem:[#allocation5 + $0x2] sm:$0x3]  ;;  %vm49_vm0 = vcmask 1041408   ;;  %vm66_vm1 = vcmask 1041409  }
  0x2e   :  { %v72_v4 = vmul.f32 %v45_v2, %v45_v2  ;;  %175 = vtanh.f32 %v42_v1  ;;  %v73_v5 = vmul.f32 %v46_v3, %v46_v3  ;;  %vm143_vm2 = vcmask 7168   ;;  %s257_s1 = smov [#allocation7]  }
  0x2f   :  { %vm145_vm3 = vcmask 15360   ;;  %s157_s9 = sshll.u32 %s257_s1, 4  ;;  %vm147_vm4 = vcmask 23552   ;;  %vm149_vm5 = vcmask 25600   ;;  %s158_s9 = int_to_ptr.vmem [resolvable:$true] %s157_s9 }
  0x30   :  { %v74_v6 = vsel %vm49_vm0, %v72_v4, 0.0  ;;  %v81_v8 = vsel %vm49_vm0, %v73_v5, 0.0  ;;  %s224_s10 = scalar_lea.vmem %s158_s9, 32  ;;  %p229_p7 = scmp.lt.s32.totalorder %s158_s9, %s158_s9 }
  0x31   :  { %v75_v7 = vrot.slane %v74_v6, 4  ;;  %v82_v9 = vrot.slane %v81_v8, 4  ;;  %p225_p6 = scmp.ne.s32.totalorder %s158_s9, %s224_s10  ;;  %p230_p8 = scmp.lt.s32.totalorder %s224_s10, %s224_s10 }
  0x33   :  { %v76_v10 = vadd.f32 %v75_v7, %v74_v6  ;;  %v83_v11 = vadd.f32 %v82_v9, %v81_v8  ;;  %p231_p9 = por %p230_p8, %p229_p7 }
  0x35   :  { %v77_v12 = vrot.slane %v76_v10, 2  ;;  %v84_v13 = vrot.slane %v83_v11, 2  ;;  %p232_p10 = pnand %p231_p9, %p225_p6 }
  0x37   :  { %v174_v14 = vpop.eup %173  ;;  %v78_v21 = vadd.f32 %v77_v12, %v76_v10  ;;  %v85_v25 = vadd.f32 %v84_v13, %v83_v11 }
  0x38   :  { %v176_v15 = vpop.eup %175  ;;  %v47_v16 = vmul.f32 %v174_v14, %v174_v14  ;;  %v95_v17 = vmul.f32 %v174_v14, %v45_v2  ;;  %v118_v18 = vsub.f32 %v174_v14, %v45_v2 }
  0x39   :  { %v48_v19 = vmul.f32 %v176_v15, %v176_v15  ;;  %v96_v20 = vmul.f32 %v176_v15, %v46_v3  ;;  %v119_v22 = vsub.f32 %v176_v15, %v46_v3  ;;  %v79_v39 = vrot.slane %v78_v21, 1 }
  0x3a   :  { %v50_v23 = vsel %vm49_vm0, %v47_v16, 0.0  ;;  %v97_v24 = vsel %vm49_vm0, %v95_v17, 0.0  ;;  %v120_v26 = vand.u32 2147483647, %v118_v18  ;;  %v86_v43 = vrot.slane %v85_v25, 1 }
  0x3b   :  { %v51_v27 = vrot.slane %v50_v23, 4  ;;  %v57_v28 = vsel %vm49_vm0, %v48_v19, 0.0  ;;  %v98_v29 = vrot.slane %v97_v24, 4  ;;  %v104_v30 = vsel %vm49_vm0, %v96_v20, 0.0 }
  0x3c   :  { %v58_v31 = vrot.slane %v57_v28, 4  ;;  %v105_v32 = vrot.slane %v104_v30, 4  ;;  %v121_v33 = vand.u32 2147483647, %v119_v22  ;;  %v122_v36 = vsel %vm49_vm0, %v120_v26, 0.0 }
  0x3d   :  { %v52_v34 = vadd.f32 %v51_v27, %v50_v23  ;;  %v99_v35 = vadd.f32 %v98_v29, %v97_v24  ;;  %v123_v40 = vrot.slane %v122_v36, 4  ;;  %v80_v57 = vadd.f32 %v79_v39, %v78_v21 }
  0x3e   :  { %v59_v37 = vadd.f32 %v58_v31, %v57_v28  ;;  %v106_v38 = vadd.f32 %v105_v32, %v104_v30  ;;  %v129_v44 = vsel %vm49_vm0, %v121_v33, 0.0  ;;  %v87_v58 = vadd.f32 %v86_v43, %v85_v25 }
  0x3f   :  { %v53_v41 = vrot.slane %v52_v34, 2  ;;  %v100_v42 = vrot.slane %v99_v35, 2  ;;  %v124_v47 = vadd.f32 %v123_v40, %v122_v36  ;;  %v130_v48 = vrot.slane %v129_v44, 4 }
  0x40   :  { %v60_v45 = vrot.slane %v59_v37, 2  ;;  %v107_v46 = vrot.slane %v106_v38, 2  ;;  %v90_v5 = vsel %vm66_vm1, %v87_v58, %v80_v57 }
  0x41   :  { %v54_v49 = vadd.f32 %v53_v41, %v52_v34  ;;  %v101_v50 = vadd.f32 %v100_v42, %v99_v35  ;;  %v125_v53 = vrot.slane %v124_v47, 2  ;;  %v131_v54 = vadd.f32 %v130_v48, %v129_v44 }
  0x42   :  { %v61_v51 = vadd.f32 %v60_v45, %v59_v37  ;;  %v108_v52 = vadd.f32 %v107_v46, %v106_v38  ;;  %v92_v13 = vsel %vm49_vm0, %v90_v5, 0.0 }
  0x43   :  { %v55_v55 = vrot.slane %v54_v49, 1  ;;  %v102_v56 = vrot.slane %v101_v50, 1  ;;  %v126_v61 = vadd.f32 %v125_v53, %v124_v47  ;;  %v132_v62 = vrot.slane %v131_v54, 2 }
  0x44   :  { %v62_v59 = vrot.slane %v61_v51, 1  ;;  %v109_v60 = vrot.slane %v108_v52, 1 }
  0x45   :  { %v56_v63 = vadd.f32 %v55_v55, %v54_v49  ;;  %v103_v0 = vadd.f32 %v102_v56, %v101_v50  ;;  %v127_v3 = vrot.slane %v126_v61, 1  ;;  %v133_v4 = vadd.f32 %v132_v62, %v131_v54 }
  0x46   :  { %v63_v1 = vadd.f32 %v62_v59, %v61_v51  ;;  %v110_v2 = vadd.f32 %v109_v60, %v108_v52 }
  0x47   :  { %v128_v8 = vadd.f32 %v127_v3, %v126_v61  ;;  %v134_v9 = vrot.slane %v133_v4, 1 }
  0x48   :  { %v67_v6 = vsel %vm66_vm1, %v63_v1, %v56_v63  ;;  %v113_v7 = vsel %vm66_vm1, %v110_v2, %v103_v0 }
  0x49   :  { %v69_v10 = vsel %vm49_vm0, %v67_v6, 0.0  ;;  %v115_v11 = vsel %vm49_vm0, %v113_v7, 0.0  ;;  %v135_v12 = vadd.f32 %v134_v9, %v133_v4 }
  0x4a   :  { %70 = vadd.xlane.f32.xlu0 %v69_v10  ;;  %116 = vadd.xlane.f32.xlu1 %v115_v11 }
  0x4b   :  { %v138_v14 = vsel %vm66_vm1, %v135_v12, %v128_v8 }
  0x4c   :  { %v140_v15 = vsel %vm49_vm0, %v138_v14, 0.0 }
  0x4e   :  { %93 = vadd.xlane.f32.xlu0 %v92_v13  ;;  %141 = vadd.xlane.f32.xlu1 %v140_v15 }
  0xd7   :  { %v71_v16 = vpop.xlane.xlu0 %70  ;;  %v117_v17 = vpop.xlane.xlu1 %116 }
  0xdb   :  { %v94_v18 = vpop.xlane.xlu0 %93  ;;  %v142_v19 = vpop.xlane.xlu1 %141 }
  0xdc   :  { %v144_v20 = vsel %vm143_vm2, %v71_v16, %v94_v18 }
  0xdd   :  { %v146_v21 = vsel %vm145_vm3, %v144_v20, %v117_v17 }
  0xde   :  { %v148_v22 = vsel %vm147_vm4, %v146_v21, %v142_v19 }
  0xdf   :  { %150 = vst.msk [vmem:[#allocation7] sm:$0x3] %vm149_vm5, %v148_v22 }
  0xe0   :  { %235 = shalt.err (!%p232_p10)
}
  0xe1   :  { %s236_s13 = scalar_lea.hbm %s333_s2, 32 }
  0xe2   :  { %p237_p11 = scmp.ne.s32.totalorder %s333_s2, %s236_s13  ;;  %p240_p12 = scmp.lt.u32.totalorder %s236_s13, %s333_s2 }
  0xe4   :  { %p242_p13 = pnand %p240_p12, %p237_p11 }
  0xe6   :  { %245 = shalt.err (!%p242_p13)
}
  0xe7   :  { %160 = dma.vmem_to_hbm [thread:$0]  %s158_s9, 32, %s333_s2, [#allocation4]  }
  0xe8   :  { %250 = dma.done.wait [#allocation4], 32  }
  0xe9   :  { %251 = vsyncadd [#allocation4], 4294967264 }
  0xea   :  { %164 = vsyncpa [#allocation3], 1 }
  0xeb   :  { %165 = vsyncpa [#allocation6], 1 }
  0xec   :  { %166 = vsyncpa [#allocation4], 1 }

</bundles_post_ra>
